<compile_context>
chip_gen: v7x
topology: tpu7x:2x2x1
jax: 0.10.0
libtpu: 0.0.40
codegen_flags: <defaults>
</compile_context>

<pallas_src>
import math

import jax
import jax.numpy as jnp
from jax.experimental import pallas as pl
from jax.experimental.pallas import tpu as pltpu


def _round_up(x, m):
    return ((x + m - 1) // m) * m


def _mlp_kernel(x_ref, w1_ref, b1_ref, w2_ref, b2_ref, o_ref):
    # hidden = relu(x @ W1 + b1): bf16 MXU operands, f32 accumulate,
    # elementwise (bias add / ReLU) in f32.
    x_bf = x_ref[...].astype(jnp.bfloat16)
    h = jnp.dot(x_bf, w1_ref[...], preferred_element_type=jnp.float32)
    h = jnp.maximum(h + b1_ref[...], 0.0)
    # action_values = hidden @ W2 + b2
    out = jnp.dot(h.astype(jnp.bfloat16), w2_ref[...],
                  preferred_element_type=jnp.float32)
    o_ref[...] = (out + b2_ref[...]).astype(o_ref.dtype)


def dqn_net_forward(x, w1, b1, w2, b2, *, batch_tile=512):
    """Fused MLP forward (fc1 -> relu -> out) as a batch-tiled Pallas kernel.

    x : (B, D_in)  float32
    w1: (D_in, H)  float32   (transpose of PyTorch fc1.weight)
    b1: (1, H)     float32
    w2: (H, D_out) float32   (transpose of PyTorch out.weight)
    b2: (1, D_out) float32
    """
    B, D_in = x.shape
    H = w1.shape[1]
    D_out = w2.shape[1]

    # Lane-dense / (8,128)-aligned padded shapes.
    Dp_in = _round_up(D_in, 128)
    Hp = _round_up(H, 128)
    Dp_out = _round_up(D_out, 128)
    # Batch tile: 512 rows for real minibatches, else the (8-aligned) batch.
    TB = batch_tile if B >= batch_tile else _round_up(max(B, 8), 8)
    Bp = _round_up(B, TB)

    # Zero padding: padded D_in rows/cols contribute 0 to the first matmul;
    # padded H rows of W2 are zero so padded hidden lanes are inert; padded
    # output columns / batch rows are sliced off below.
    xp = jnp.zeros((Bp, Dp_in), jnp.float32).at[:B, :D_in].set(x)
    w1p = jnp.zeros((Dp_in, Hp), jnp.bfloat16).at[:D_in, :H].set(
        w1.astype(jnp.bfloat16))
    b1p = jnp.zeros((1, Hp), jnp.float32).at[:, :H].set(b1)
    w2p = jnp.zeros((Hp, Dp_out), jnp.bfloat16).at[:H, :D_out].set(
        w2.astype(jnp.bfloat16))
    b2p = jnp.zeros((1, Dp_out), jnp.float32).at[:, :D_out].set(b2)

    grid = (Bp // TB,)
    out_padded = pl.pallas_call(
        _mlp_kernel,
        out_shape=jax.ShapeDtypeStruct((Bp, Dp_out), jnp.float32),
        grid=grid,
        in_specs=[
            # x: one batch tile per grid step.
            pl.BlockSpec((TB, Dp_in), lambda i: (i, 0)),
            # Weights / biases: constant index_map -> stay resident in VMEM.
            pl.BlockSpec((Dp_in, Hp), lambda i: (0, 0)),
            pl.BlockSpec((1, Hp), lambda i: (0, 0)),
            pl.BlockSpec((Hp, Dp_out), lambda i: (0, 0)),
            pl.BlockSpec((1, Dp_out), lambda i: (0, 0)),
        ],
        out_specs=pl.BlockSpec((TB, Dp_out), lambda i: (i, 0)),
        compiler_params=pltpu.CompilerParams(
            dimension_semantics=("parallel",),  # megacore sharding on v7x
            vmem_limit_bytes=32 * 1024 * 1024,
        ),
    )(xp, w1p, b1p, w2p, b2p)

    return out_padded[:B, :D_out]


def init_params(key, input_dim, hidden_dim, output_dim):
    """Deterministic params matching the PyTorch module's init scheme:
    weights ~ N(0, 0.1), biases ~ U(-1/sqrt(fan_in), 1/sqrt(fan_in))."""
    k1, k2, k3, k4 = jax.random.split(key, 4)
    # Stored as (in, out) = transpose of PyTorch's (out, in) weight layout.
    w1 = 0.1 * jax.random.normal(k1, (input_dim, hidden_dim), jnp.float32)
    w2 = 0.1 * jax.random.normal(k2, (hidden_dim, output_dim), jnp.float32)
    bound1 = 1.0 / math.sqrt(input_dim)
    bound2 = 1.0 / math.sqrt(hidden_dim)
    b1 = jax.random.uniform(k3, (1, hidden_dim), jnp.float32, -bound1, bound1)
    b2 = jax.random.uniform(k4, (1, output_dim), jnp.float32, -bound2, bound2)
    return w1, b1, w2, b2


if __name__ == "__main__":
    # Small DQN-ish shapes: batch=2 states, state_dim=16, hidden=32, actions=4
    batch, input_dim, hidden_dim, output_dim = 2, 16, 32, 4

    key = jax.random.PRNGKey(0)
    kx, kp = jax.random.split(key)
    x = jax.random.normal(kx, (batch, input_dim), jnp.float32)
    w1, b1, w2, b2 = init_params(kp, input_dim, hidden_dim, output_dim)

    action_values = dqn_net_forward(x, w1, b1, w2, b2)
    jax.block_until_ready(action_values)
    assert action_values.shape == (batch, output_dim)

    # Tight check against a bf16-operand / f32-accumulate JAX reference
    # (same numerics as the kernel's MXU path).
    h_ref = jnp.dot(x.astype(jnp.bfloat16), w1.astype(jnp.bfloat16),
                    preferred_element_type=jnp.float32)
    h_ref = jnp.maximum(h_ref + b1, 0.0)
    ref_bf16 = jnp.dot(h_ref.astype(jnp.bfloat16), w2.astype(jnp.bfloat16),
                       preferred_element_type=jnp.float32) + b2
    assert jnp.allclose(action_values, ref_bf16, atol=1e-3, rtol=1e-3)

    # Loose check against the full-f32 PyTorch-equivalent forward.
    ref_f32 = jnp.maximum(x @ w1 + b1, 0.0) @ w2 + b2
    assert jnp.allclose(action_values, ref_f32, atol=5e-2, rtol=5e-2)

    print("KERNEL_OK")
</pallas_src>

<mosaic_0001>
module attributes {stable_mosaic.version = 11 : i64} {
  func.func @_mlp_kernel(%arg0: i32, %arg1: memref<8x128xf32, #tpu.memory_space<vmem>>, %arg2: memref<128x128xbf16, #tpu.memory_space<vmem>>, %arg3: memref<1x128xf32, #tpu.memory_space<vmem>>, %arg4: memref<128x128xbf16, #tpu.memory_space<vmem>>, %arg5: memref<1x128xf32, #tpu.memory_space<vmem>>, %arg6: memref<8x128xf32, #tpu.memory_space<vmem>>) attributes {dimension_semantics = [#tpu.dimension_semantics<parallel>], iteration_bounds = array<i64: 1>, scalar_prefetch = 0 : i64, scratch_operands = 0 : i64, tpu.core_type = #tpu.core_type<tc>, window_params = [{transform_indices = @transform_0, window_bounds = array<i64: 8, 128>}, {pipeline_mode = #tpu.pipeline_mode<synchronous>, transform_indices = @transform_1, window_bounds = array<i64: 128, 128>}, {pipeline_mode = #tpu.pipeline_mode<synchronous>, transform_indices = @transform_2, window_bounds = array<i64: 1, 128>}, {pipeline_mode = #tpu.pipeline_mode<synchronous>, transform_indices = @transform_3, window_bounds = array<i64: 128, 128>}, {pipeline_mode = #tpu.pipeline_mode<synchronous>, transform_indices = @transform_4, window_bounds = array<i64: 1, 128>}, {transform_indices = @transform_5, window_bounds = array<i64: 8, 128>}]} {
    %c0 = arith.constant 0 : index
    %c0_0 = arith.constant 0 : index
    %0 = vector.load %arg1[%c0, %c0_0] : memref<8x128xf32, #tpu.memory_space<vmem>>, vector<8x128xf32>
    %1 = arith.truncf %0 : vector<8x128xf32> to vector<8x128xbf16>
    %c0_1 = arith.constant 0 : index
    %c0_2 = arith.constant 0 : index
    %2 = vector.load %arg2[%c0_1, %c0_2] : memref<128x128xbf16, #tpu.memory_space<vmem>>, vector<128x128xbf16>
    %cst = arith.constant dense<0.000000e+00> : vector<8x128xf32>
    %3 = tpu.matmul %1, %2, %cst {dimension_numbers = #tpu.dot_dimension_numbers<[1], [0], [0], [1], [0, 0, 1, 1], [], []>} : vector<8x128xbf16>, vector<128x128xbf16>, vector<8x128xf32> -> vector<8x128xf32>
    %c0_3 = arith.constant 0 : index
    %c0_4 = arith.constant 0 : index
    %4 = vector.load %arg3[%c0_3, %c0_4] : memref<1x128xf32, #tpu.memory_space<vmem>>, vector<1x128xf32>
    %5 = vector.broadcast %4 : vector<1x128xf32> to vector<8x128xf32>
    %6 = arith.addf %3, %5 : vector<8x128xf32>
    %cst_5 = arith.constant 0.000000e+00 : f32
    %7 = vector.broadcast %cst_5 : f32 to vector<8x128xf32>
    %8 = arith.maximumf %6, %7 : vector<8x128xf32>
    %9 = arith.truncf %8 : vector<8x128xf32> to vector<8x128xbf16>
    %c0_6 = arith.constant 0 : index
    %c0_7 = arith.constant 0 : index
    %10 = vector.load %arg4[%c0_6, %c0_7] : memref<128x128xbf16, #tpu.memory_space<vmem>>, vector<128x128xbf16>
    %cst_8 = arith.constant dense<0.000000e+00> : vector<8x128xf32>
    %11 = tpu.matmul %9, %10, %cst_8 {dimension_numbers = #tpu.dot_dimension_numbers<[1], [0], [0], [1], [0, 0, 1, 1], [], []>} : vector<8x128xbf16>, vector<128x128xbf16>, vector<8x128xf32> -> vector<8x128xf32>
    %c0_9 = arith.constant 0 : index
    %c0_10 = arith.constant 0 : index
    %12 = vector.load %arg5[%c0_9, %c0_10] : memref<1x128xf32, #tpu.memory_space<vmem>>, vector<1x128xf32>
    %13 = vector.broadcast %12 : vector<1x128xf32> to vector<8x128xf32>
    %14 = arith.addf %11, %13 : vector<8x128xf32>
    %c0_11 = arith.constant 0 : index
    %c0_12 = arith.constant 0 : index
    %15 = vector.load %arg6[%c0_11, %c0_12] : memref<8x128xf32, #tpu.memory_space<vmem>>, vector<8x128xf32>
    tpu.vector_store %arg6[%c0_11, %c0_12], %14 {strides = array<i32>} : memref<8x128xf32, #tpu.memory_space<vmem>>, vector<8x128xf32>,
    return
  }
  func.func @transform_0(%arg0: i32) -> (i32, i32) {
    %c0_i32 = arith.constant 0 : i32
    %c0_i32_0 = arith.constant 0 : i32
    return %arg0, %c0_i32 : i32, i32
  }
  func.func @transform_1(%arg0: i32) -> (i32, i32) {
    %c0_i32 = arith.constant 0 : i32
    %c0_i32_0 = arith.constant 0 : i32
    %c0_i32_1 = arith.constant 0 : i32
    return %c0_i32, %c0_i32_0 : i32, i32
  }
  func.func @transform_2(%arg0: i32) -> (i32, i32) {
    %c0_i32 = arith.constant 0 : i32
    %c0_i32_0 = arith.constant 0 : i32
    %c0_i32_1 = arith.constant 0 : i32
    return %c0_i32, %c0_i32_0 : i32, i32
  }
  func.func @transform_3(%arg0: i32) -> (i32, i32) {
    %c0_i32 = arith.constant 0 : i32
    %c0_i32_0 = arith.constant 0 : i32
    %c0_i32_1 = arith.constant 0 : i32
    return %c0_i32, %c0_i32_0 : i32, i32
  }
  func.func @transform_4(%arg0: i32) -> (i32, i32) {
    %c0_i32 = arith.constant 0 : i32
    %c0_i32_0 = arith.constant 0 : i32
    %c0_i32_1 = arith.constant 0 : i32
    return %c0_i32, %c0_i32_0 : i32, i32
  }
  func.func @transform_5(%arg0: i32) -> (i32, i32) {
    %c0_i32 = arith.constant 0 : i32
    %c0_i32_0 = arith.constant 0 : i32
    return %arg0, %c0_i32 : i32, i32
  }
}

</mosaic_0001>

<bundles_post_ra>
// kernel: tpu_custom_call.1
= control target key start
LH: loop header
LB: loop body
LE: loop exit
PB: predicated region body
PF: predicated region fallthrough
CT: control target
= control target key end

     0   :  { %10 = vsyncpa [#allocation3], 0  ;;  %s596_s0 = inlined_call_operand.hbm [shape: f32[8,128], index: 0, kind: input, shape index: {}]   ;;  %s597_s1 = inlined_call_operand.hbm [shape: bf16[128,128], index: 1, kind: input, shape index: {}]   ;;  %s598_s2 = inlined_call_operand.vmem [shape: f32[1,128], index: 2, kind: input, shape index: {}]   ;;  %s599_s3 = inlined_call_operand.hbm [shape: bf16[128,128], index: 3, kind: input, shape index: {}]   ;;  %s600_s4 = inlined_call_operand.vmem [shape: f32[1,128], index: 4, kind: input, shape index: {}]   ;;  %s601_s5 = inlined_call_operand.hbm [shape: f32[8,128], index: 5, kind: output, shape index: {}]  }
   0x1   :  { %11 = vsyncpa [#allocation6], 0 }
   0x2   :  { %12 = vsyncpa [#allocation4], 0  ;;  %s498_s18 = smov [#allocation5]   ;;  %s404_s22 = scalar_lea.hbm %s597_s1, 1024 }
   0x3   :  { %s28_s19 = sshll.u32 %s498_s18, 4  ;;  %p405_p0 = scmp.ne.s32.totalorder %s597_s1, %s404_s22  ;;  %s29_s19 = int_to_ptr.vmem [resolvable:$true] %s28_s19 }
   0x4   :  { %p408_p1 = scmp.lt.u32.totalorder %s404_s22, %s597_s1 }
   0x6   :  { %p410_p2 = pnand %p408_p1, %p405_p0 }
   0x8   :  { %413 = shalt.err (!%p410_p2)
}
   0x9   :  { %s414_s27 = scalar_lea.vmem %s29_s19, 1024  ;;  %p419_p4 = scmp.lt.s32.totalorder %s29_s19, %s29_s19 }
   0xa   :  { %p415_p3 = scmp.ne.s32.totalorder %s29_s19, %s414_s27  ;;  %p420_p5 = scmp.lt.s32.totalorder %s414_s27, %s414_s27 }
   0xc   :  { %p421_p6 = por %p420_p5, %p419_p4 }
   0xe   :  { %p422_p7 = pnand %p421_p6, %p415_p3 }
  0x10   :  { %425 = shalt.err (!%p422_p7)
}
  0x11   :  { %s499_s28 = smov 64   ;;  %s500_s29 = smov 4  }
  0x12   :  { %34 = dma.hbm_to_vmem [thread:$0]  %s597_s1, 1024, %s29_s19, [#allocation6], %s499_s28, %s499_s28, %s500_s29  }
  0x13   :  { %s501_s7 = smov [#allocation2]   ;;  %s502_s9 = smov [#allocation7]  }
  0x14   :  { %s19_s8 = sshll.u32 %s501_s7, 4  ;;  %s42_s10 = sshll.u32 %s502_s9, 4  ;;  %s20_s8 = int_to_ptr.vmem [resolvable:$true] %s19_s8  ;;  %s43_s10 = int_to_ptr.vmem [resolvable:$true] %s42_s10 }
  0x15   :  { %s426_s13 = scalar_lea.hbm %s596_s0, 128 }
  0x16   :  { %p427_p8 = scmp.ne.s32.totalorder %s596_s0, %s426_s13  ;;  %p430_p9 = scmp.lt.u32.totalorder %s426_s13, %s596_s0 }
  0x18   :  { %p432_p10 = pnand %p430_p9, %p427_p8 }
  0x1a   :  { %435 = shalt.err (!%p432_p10)
}
  0x1b   :  { %s436_s1 = scalar_lea.vmem %s20_s8, 128  ;;  %p441_p12 = scmp.lt.s32.totalorder %s20_s8, %s20_s8 }
  0x1c   :  { %p437_p11 = scmp.ne.s32.totalorder %s20_s8, %s436_s1  ;;  %p442_p13 = scmp.lt.s32.totalorder %s436_s1, %s436_s1 }
  0x1e   :  { %p443_p0 = por %p442_p13, %p441_p12 }
  0x20   :  { %p444_p1 = pnand %p443_p0, %p437_p11 }
  0x22   :  { %447 = shalt.err (!%p444_p1)
}
  0x23   :  { %22 = dma.hbm_to_vmem [thread:$0]  %s596_s0, 128, %s20_s8, [#allocation3]  }
  0x24   :  { %s448_s22 = scalar_lea.hbm %s599_s3, 1024 }
  0x25   :  { %p449_p2 = scmp.ne.s32.totalorder %s599_s3, %s448_s22  ;;  %p452_p3 = scmp.lt.u32.totalorder %s448_s22, %s599_s3 }
  0x27   :  { %p454_p4 = pnand %p452_p3, %p449_p2 }
  0x29   :  { %457 = shalt.err (!%p454_p4)
}
  0x2a   :  { %s458_s27 = scalar_lea.vmem %s43_s10, 1024  ;;  %p463_p6 = scmp.lt.s32.totalorder %s43_s10, %s43_s10 }
  0x2b   :  { %p459_p5 = scmp.ne.s32.totalorder %s43_s10, %s458_s27  ;;  %p464_p7 = scmp.lt.s32.totalorder %s458_s27, %s458_s27 }
  0x2d   :  { %p465_p8 = por %p464_p7, %p463_p6 }
  0x2f   :  { %p466_p9 = pnand %p465_p8, %p459_p5 }
  0x31   :  { %469 = shalt.err (!%p466_p9)
}
  0x32   :  { %48 = dma.hbm_to_vmem [thread:$0]  %s599_s3, 1024, %s43_s10, [#allocation6], %s499_s28, %s499_s28, %s500_s29  }
  0x33   :  { %492 = dma.done.wait [#allocation3], 128  }
  0x34   :  { %493 = vsyncadd [#allocation3], 4294967168 }
  0x35   :  { %494 = dma.done.wait [#allocation6], 2048  }
  0x36   :  { %495 = vsyncadd [#allocation6], 4294965248  ;;  %v503_v0 = vmov 0.0   ;;  %vm504_vm0 = vmmov 0   ;;  %v388_v1 = vld [vmem:[#allocation5] sm:$0xff]   ;;  %v389_v2 = vld [vmem:[#allocation5 + $0x8] sm:$0xff]  }
  0x37   :  { %340 = vmatprep.subr.bf16.mxu0 %v503_v0  ;;  %356 = vmatprep.mubr.msk.bf16.mxu0 %vm504_vm0, %v503_v0  ;;  %v390_v3 = vld [vmem:[#allocation5 + $0x10] sm:$0xff]   ;;  %v396_v4 = vld [vmem:[#allocation7] sm:$0xff]   ;;  %v391_v5 = vld [vmem:[#allocation5 + $0x18] sm:$0xff]   ;;  %s505_s7 = smov [#allocation8]  }
  0x38   :  { %360 = vmatprep.subr.bf16.mxu1 %v503_v0  ;;  %376 = vmatprep.mubr.msk.bf16.mxu1 %vm504_vm0, %v503_v0  ;;  %v397_v6 = vld [vmem:[#allocation7 + $0x8] sm:$0xff]   ;;  %v392_v7 = vld [vmem:[#allocation5 + $0x20] sm:$0xff]   ;;  %v398_v8 = vld [vmem:[#allocation7 + $0x10] sm:$0xff]   ;;  %s294_s8 = sshll.u32 %s505_s7, 4  ;;  %s295_s8 = int_to_ptr.vmem [resolvable:$true] %s294_s8 }
  0x39   :  { %341 = vmatpush3.bf16.msra.mxu0 %v388_v1  ;;  %361 = vmatpush3.bf16.msra.mxu1 %v396_v4  ;;  %v393_v9 = vld [vmem:[#allocation5 + $0x28] sm:$0xff]   ;;  %v399_v10 = vld [vmem:[#allocation7 + $0x18] sm:$0xff]   ;;  %v394_v11 = vld [vmem:[#allocation5 + $0x30] sm:$0xff]   ;;  %p475_p11 = scmp.lt.s32.totalorder %s295_s8, %s295_s8 }
  0x3a   :  { %342 = vmatprep.subr.bf16.mxu0 %v503_v0  ;;  %362 = vmatprep.subr.bf16.mxu1 %v503_v0  ;;  %v400_v12 = vld [vmem:[#allocation7 + $0x20] sm:$0xff]   ;;  %v395_v13 = vld [vmem:[#allocation5 + $0x38] sm:$0xff]   ;;  %v401_v15 = vld [vmem:[#allocation7 + $0x28] sm:$0xff]  }
  0x3b   :  { %v61_v14 = vld [vmem:[#allocation2] sm:$0xff]  ;;  %v402_v17 = vld [vmem:[#allocation7 + $0x30] sm:$0xff]  }
  0x3c   :  { %v62_v16 = vpack.c.bf16 %v61_v14, %v61_v14  ;;  %v403_v18 = vld [vmem:[#allocation7 + $0x38] sm:$0xff]  }
  0x3d   :  { %343 = vmatpush3.bf16.msra.mxu0 %v389_v2  ;;  %363 = vmatpush3.bf16.msra.mxu1 %v397_v6  ;;  %v304_v19 = vld [vmem:[%s598_s2] ss:$0 sm:$0xff]  ;;  %s470_s2 = scalar_lea.vmem %s295_s8, 128 }
  0x3e   :  { %344 = vmatprep.subr.bf16.mxu0 %v503_v0  ;;  %364 = vmatprep.subr.bf16.mxu1 %v503_v0  ;;  %v313_v27 = vld [vmem:[%s600_s4] ss:$0 sm:$0xff]  ;;  %p471_p10 = scmp.ne.s32.totalorder %s295_s8, %s470_s2  ;;  %p476_p12 = scmp.lt.s32.totalorder %s470_s2, %s470_s2 }
  0x40   :  { %p477_p13 = por %p476_p12, %p475_p11 }
  0x41   :  { %345 = vmatpush3.bf16.msra.mxu0 %v390_v3  ;;  %365 = vmatpush3.bf16.msra.mxu1 %v398_v8 }
  0x42   :  { %346 = vmatprep.subr.bf16.mxu0 %v503_v0  ;;  %366 = vmatprep.subr.bf16.mxu1 %v503_v0  ;;  %p478_p0 = pnand %p477_p13, %p471_p10 }
  0x45   :  { %347 = vmatpush3.bf16.msra.mxu0 %v391_v5  ;;  %367 = vmatpush3.bf16.msra.mxu1 %v399_v10 }
  0x46   :  { %348 = vmatprep.subr.bf16.mxu0 %v503_v0  ;;  %368 = vmatprep.subr.bf16.mxu1 %v503_v0 }
  0x49   :  { %349 = vmatpush3.bf16.msra.mxu0 %v392_v7  ;;  %369 = vmatpush3.bf16.msra.mxu1 %v400_v12 }
  0x4a   :  { %350 = vmatprep.subr.bf16.mxu0 %v503_v0  ;;  %370 = vmatprep.subr.bf16.mxu1 %v503_v0 }
  0x4d   :  { %351 = vmatpush3.bf16.msra.mxu0 %v393_v9  ;;  %371 = vmatpush3.bf16.msra.mxu1 %v401_v15 }
  0x4e   :  { %352 = vmatprep.subr.bf16.mxu0 %v503_v0  ;;  %372 = vmatprep.subr.bf16.mxu1 %v503_v0 }
  0x51   :  { %353 = vmatpush3.bf16.msra.mxu0 %v394_v11  ;;  %373 = vmatpush3.bf16.msra.mxu1 %v402_v17 }
  0x52   :  { %354 = vmatprep.subr.bf16.mxu0 %v503_v0  ;;  %374 = vmatprep.subr.bf16.mxu1 %v503_v0 }
  0x55   :  { %355 = vmatpush3.bf16.msra.mxu0 %v395_v13  ;;  %375 = vmatpush3.bf16.msra.mxu1 %v403_v18 }
  0x58   :  { %357 = vmatmul.mubr.bf16.vlgmr.msra.gmra.mrb[0].mxu0 %v62_v16 }
 0x12b   :  { %v168_v20 = vpop.f32.mrb[0].mxu0 }
 0x12c   :  { %v169_v21 = vadd.f32 %v304_v19, %v168_v20  ;;  %v358_v22 = vpop.f32.mrb[1].mxu0 }
 0x12d   :  { %v171_v23 = vpop.f32.mrb[2].mxu0 }
 0x12e   :  { %v174_v24 = vmax.f32 %v169_v21, 0.0  ;;  %v359_v25 = vpop.f32.mrb[3].mxu0 }
 0x130   :  { %v175_v26 = vpack.c.bf16 %v174_v24, %v174_v24 }
 0x132   :  { %377 = vmatmul.mubr.bf16.vlgmr.msra.gmra.mrb[0].mxu1 %v175_v26 }
 0x205   :  { %v281_v28 = vpop.f32.mrb[0].mxu1 }
 0x206   :  { %v282_v29 = vadd.f32 %v313_v27, %v281_v28  ;;  %v378_v30 = vpop.f32.mrb[1].mxu1 }
 0x207   :  { %v284_v31 = vpop.f32.mrb[2].mxu1 }
 0x208   :  { %287 = vst [vmem:[#allocation8] sm:$0xff] %v282_v29  ;;  %v379_v32 = vpop.f32.mrb[3].mxu1 }
 0x209   :  { %481 = shalt.err (!%p478_p0)
}
 0x20a   :  { %s482_s4 = scalar_lea.hbm %s601_s5, 128 }
 0x20b   :  { %p483_p1 = scmp.ne.s32.totalorder %s601_s5, %s482_s4  ;;  %p486_p2 = scmp.lt.u32.totalorder %s482_s4, %s601_s5 }
 0x20d   :  { %p488_p3 = pnand %p486_p2, %p483_p1 }
 0x20f   :  { %491 = shalt.err (!%p488_p3)
}
 0x210   :  { %297 = dma.vmem_to_hbm [thread:$0]  %s295_s8, 128, %s601_s5, [#allocation4]  }
 0x211   :  { %496 = dma.done.wait [#allocation4], 128  }
 0x212   :  { %497 = vsyncadd [#allocation4], 4294967168 }
 0x213   :  { %301 = vsyncpa [#allocation3], 1 }
 0x214   :  { %302 = vsyncpa [#allocation6], 1 }
 0x215   :  { %303 = vsyncpa [#allocation4], 1 }

</bundles_post_ra>
